<compile_context>
chip_gen: v5e
topology: v5e:2x2
jax: 0.10.0
libtpu: 0.0.40
codegen_flags: <defaults>
</compile_context>

<pallas_src>
import numpy as np
import jax
import jax.numpy as jnp
from jax import lax
from jax.experimental import pallas as pl
from jax.experimental.pallas import tpu as pltpu


def _graph_attn_forward_impl(inp, adj, attn_weight):
    """Pallas TPU implementation of GraphAttnLayer.forward (eval mode).

    inp:         (B, N, D) float32
    adj:         (B, N, M) float32,  M = 2*N*D // (2*D - 1)
    attn_weight: (n_head, (2*D)//n_head, 1) float32
    returns:     (B, N, M) float32 row-softmaxed masked attention scores
    """
    B, N, D = inp.shape
    K, Hd, _ = attn_weight.shape
    C = K * Hd                                   # = 2*D - 1
    assert (2 * D) % K == 1, "reference module asserts (2*n_embd) % n_head == 1"
    assert C == 2 * D - 1
    assert (2 * N * D) % C == 0, "reference .view() requires C | 2*N*D"
    M = (2 * N * D) // C
    assert M % 2 == 0                            # C odd and M*C = 2*N*D  =>  M even
    Mh = M // 2                                  # N*D == Mh*C
    assert adj.shape == (B, N, M)

    f32 = jnp.float32
    inp = inp.astype(f32)
    adj = adj.astype(f32)
    w_flat = attn_weight.reshape(C).astype(f32)  # row-major (k, h) flatten

    # --------------------------------------------------------------- constants
    # Output element (b, n, m):  t = m // Mh,  u = 2n + t,  seg = u // N,
    # slab s = 2b + seg,  source batch src = s % B,  node = u % N,  jm = m % Mh.
    #   s <  B ("A-form"): att = sum_c w[c] * inp[src, node, (jm*C + c) % D]
    #                          = (inp[src, node] @ WA)[jm]
    #   s >= B ("B-form"): att = sum_c w[c] * inp[src].reshape(Mh, C)[jm, c]
    #                          = g[src, jm]                (independent of n)
    jm_c = np.arange(Mh)[:, None] * C + np.arange(C)[None, :]      # (Mh, C)
    hit = (jm_c % D)[:, :, None] == np.arange(D)[None, None, :]    # (Mh, C, D)
    WA = jnp.sum(jnp.asarray(hit, f32) * w_flat[None, :, None], axis=1).T   # (D, Mh)
    # Both column halves share WA -> block-diagonal (2D, M) weight so the kernel
    # needs a single matmul and no in-kernel lane concat.
    WAA = jnp.zeros((2 * D, M), f32)
    WAA = WAA.at[:D, :Mh].set(WA).at[D:, Mh:].set(WA)

    # One B-form row per SOURCE batch (elementwise f32, no matmul rounding).
    g = jnp.sum(inp.reshape(B, Mh, C) * w_flat[None, None, :], axis=-1)     # (B, Mh)
    g_full = jnp.concatenate([g, g], axis=-1)                               # (B, M)

    # ----------------------------------------------- per-batch gather tables
    # Which form applies is a static per-(b, slab) property; the wrapper zeroes
    # the inapplicable contribution so the kernel is a plain `y + g_select`.
    n_arr = np.arange(N)
    src_np = np.zeros((B, N, 2), np.int32)
    node_np = np.zeros((B, N, 2), np.int32)
    amask_np = np.zeros((B, N, 2), np.float32)       # 1.0 where A-form applies
    gsrc_np = np.zeros((B, 2), np.int32)
    gmask_np = np.zeros((B, 2), np.float32)          # 1.0 where B-form applies
    for b in range(B):
        for t in range(2):
            u = 2 * n_arr + t
            seg = u // N
            s = 2 * b + seg
            src_np[b, :, t] = s % B
            node_np[b, :, t] = u % N
            amask_np[b, :, t] = (s < B).astype(np.float32)
        for seg in range(2):
            s = 2 * b + seg
            gsrc_np[b, seg] = s % B
            gmask_np[b, seg] = 0.0 if s < B else 1.0

    # Pre-gathered A-form rows, both halves concatenated on the feature axis.
    xa = inp[jnp.asarray(src_np), jnp.asarray(node_np)]                     # (B, N, 2, D)
    xa = (xa * jnp.asarray(amask_np)[..., None]).reshape(B, N, 2 * D)
    # Per-batch pair of B-form rows (slab 0 / slab 1), zeroed where A-form applies.
    gpair = g_full[jnp.asarray(gsrc_np)] * jnp.asarray(gmask_np)[..., None]  # (B, 2, M)

    n0_left = (N + 1) // 2      # rows whose LEFT  half (t=0) comes from slab 0
    n0_right = N // 2           # rows whose RIGHT half (t=1) comes from slab 0

    # ------------------------------------------------------------------ kernel
    def kernel(xa_ref, adj_ref, waa_ref, g_ref, out_ref):
        # One whole batch per grid step.
        y = jnp.dot(xa_ref[0], waa_ref[...],
                    preferred_element_type=jnp.float32)                      # (N, M)

        rows = lax.broadcasted_iota(jnp.int32, (N, M), 0)
        lanes = lax.broadcasted_iota(jnp.int32, (N, M), 1)
        n0 = jnp.where(lanes < Mh, n0_left, n0_right)
        in_seg0 = rows < n0                                                  # slab 0 vs 1

        gall = g_ref[0]                                                      # (2, M)
        att = y + jnp.where(in_seg0, gall[0:1, :], gall[1:2, :])

        # masked_fill(mask_adj == 0, 0): masked edges become 0 (NOT -inf),
        # exactly as in the PyTorch reference.
        att = jnp.where(adj_ref[0] > 0.0, att, 0.0)
        # F.leaky_relu, default negative_slope = 0.01
        att = jnp.where(att >= 0.0, att, 0.01 * att)

        att = att - jnp.max(att, axis=-1, keepdims=True)
        e = jnp.exp(att)
        denom = jnp.sum(e, axis=-1, keepdims=True)
        r = pl.reciprocal(denom, approx=True)                                # EUP
        r = r * (2.0 - denom * r)                # one Newton step -> f32-accurate 1/denom
        out_ref[0] = (e * r).astype(out_ref.dtype)
        # attn_drop: nn.Dropout is identity in eval mode.
        # TODO(synk): training-mode dropout would need pltpu.prng_seed/prng_random_bits.

    out = pl.pallas_call(
        kernel,
        out_shape=jax.ShapeDtypeStruct((B, N, M), jnp.float32),
        grid=(B,),
        in_specs=[
            pl.BlockSpec((1, N, 2 * D), lambda b: (b, 0, 0)),   # gathered A-form rows
            pl.BlockSpec((1, N, M), lambda b: (b, 0, 0)),       # adj (no padding pass)
            pl.BlockSpec((2 * D, M), lambda b: (0, 0)),         # constant weight
            pl.BlockSpec((1, 2, M), lambda b: (b, 0, 0)),       # B-form row pair
        ],
        out_specs=pl.BlockSpec((1, N, M), lambda b: (b, 0, 0)),
        compiler_params=pltpu.CompilerParams(
            dimension_semantics=("parallel",),                  # >=2 steps -> v7x megacore
        ),
    )(xa, adj, WAA, gpair)
    return out


graph_attn_forward = jax.jit(_graph_attn_forward_impl)


def _pure_jax_reference(inp, adj, attn_weight):
    """Direct transcription of the PyTorch forward (for verification)."""
    B, N, D = inp.shape
    K, H, _ = attn_weight.shape
    a = jnp.tile(inp, (1, 1, N)).reshape(B, N * N, D)
    b = jnp.tile(inp, (1, N, 1))
    pair_mat = jnp.concatenate([a, b], axis=0).reshape(B, N, -1, K, H)
    att = jnp.einsum('kho,bmnkh->bmn', attn_weight, pair_mat,
                     precision=jax.lax.Precision.HIGHEST)
    mask_adj = (adj > 0).astype(jnp.float32)
    att = jnp.where(mask_adj == 0, 0.0, att)
    att = jax.nn.softmax(jax.nn.leaky_relu(att, negative_slope=0.01), axis=-1)
    return att


if __name__ == "__main__":
    # Shapes consistent with the module's asserts:
    #   n_embd (D) = 4 -> self.n_embd = 8;  n_head = 7 (8 % 7 == 1, head_dim = 1)
    #   N = 7 so the reference view yields an integer M = 2*N*D / (2*D - 1) = 8.
    n_embd, n_head = 4, 7
    head_dim = (2 * n_embd) // n_head

    def run_case(B, N, key):
        D = n_embd
        M = (2 * N * D) // (n_head * head_dim)
        k_inp, k_adj, k_w = jax.random.split(key, 3)
        inp = jax.random.normal(k_inp, (B, N, D), dtype=jnp.float32)
        # random adjacency values; ~half non-positive so the masking path is exercised
        adj = jax.random.normal(k_adj, (B, N, M), dtype=jnp.float32)
        # reference __init__ uses torch.zeros; use a deterministic non-degenerate
        # init here so the kernel output is non-trivial.
        attn_weight = 0.1 * jax.random.normal(
            k_w, (n_head, head_dim, 1), dtype=jnp.float32)

        out = jax.block_until_ready(graph_attn_forward(inp, adj, attn_weight))
        ref = _pure_jax_reference(inp, adj, attn_weight)
        assert out.shape == (B, N, M)
        err = float(jnp.max(jnp.abs(out - ref)))
        assert jnp.allclose(out, ref, atol=7e-3, rtol=5e-2), (
            f"Pallas output mismatch vs reference (B={B}): max abs err {err}")
        return out

    key = jax.random.PRNGKey(0)
    k0, k1 = jax.random.split(key)
    # B=2: batch 0 exercises the "node broadcast" path, batch 1 the "full matrix" path.
    run_case(2, 7, k0)
    # B=3: the middle batch mixes both paths within its rows (odd-B case).
    run_case(3, 7, k1)

    print("KERNEL_OK")
</pallas_src>

<mosaic_0001>
module attributes {stable_mosaic.version = 11 : i64} {
  func.func @kernel(%arg0: i32, %arg1: memref<1x7x8xf32, #tpu.memory_space<vmem>>, %arg2: memref<1x7x8xf32, #tpu.memory_space<vmem>>, %arg3: memref<8x8xf32, #tpu.memory_space<vmem>>, %arg4: memref<1x2x8xf32, #tpu.memory_space<vmem>>, %arg5: memref<1x7x8xf32, #tpu.memory_space<vmem>>) attributes {dimension_semantics = [#tpu.dimension_semantics<parallel>], iteration_bounds = array<i64: 2>, scalar_prefetch = 0 : i64, scratch_operands = 0 : i64, tpu.core_type = #tpu.core_type<tc>, window_params = [{transform_indices = @transform_0, window_bounds = array<i64: 1, 7, 8>}, {transform_indices = @transform_1, window_bounds = array<i64: 1, 7, 8>}, {pipeline_mode = #tpu.pipeline_mode<synchronous>, transform_indices = @transform_2, window_bounds = array<i64: 8, 8>}, {transform_indices = @transform_3, window_bounds = array<i64: 1, 2, 8>}, {transform_indices = @transform_4, window_bounds = array<i64: 1, 7, 8>}]} {
    %c0 = arith.constant 0 : index
    %c0_0 = arith.constant 0 : index
    %c0_1 = arith.constant 0 : index
    %0 = vector.load %arg1[%c0, %c0_0, %c0_1] : memref<1x7x8xf32, #tpu.memory_space<vmem>>, vector<1x7x8xf32>
    %1 = vector.shape_cast %0 : vector<1x7x8xf32> to vector<7x8xf32>
    %c0_2 = arith.constant 0 : index
    %c0_3 = arith.constant 0 : index
    %2 = vector.load %arg3[%c0_2, %c0_3] : memref<8x8xf32, #tpu.memory_space<vmem>>, vector<8x8xf32>
    %cst = arith.constant dense<0.000000e+00> : vector<7x8xf32>
    %3 = tpu.matmul %1, %2, %cst {dimension_numbers = #tpu.dot_dimension_numbers<[1], [0], [0], [1], [0, 0, 1, 1], [], []>} : vector<7x8xf32>, vector<8x8xf32>, vector<7x8xf32> -> vector<7x8xf32>
    %4 = tpu.iota {dimensions = array<i32: 0>} : vector<7x8xi32>
    %5 = tpu.iota {dimensions = array<i32: 1>} : vector<7x8xi32>
    %c4_i32 = arith.constant 4 : i32
    %6 = vector.broadcast %c4_i32 : i32 to vector<7x8xi32>
    %7 = arith.cmpi slt, %5, %6 : vector<7x8xi32>
    %c4_i32_4 = arith.constant 4 : i32
    %c3_i32 = arith.constant 3 : i32
    %8 = vector.broadcast %c4_i32_4 : i32 to vector<7x8xi32>
    %9 = vector.broadcast %c3_i32 : i32 to vector<7x8xi32>
    %10 = arith.select %7, %8, %9 : vector<7x8xi1>, vector<7x8xi32>
    %11 = arith.cmpi slt, %4, %10 : vector<7x8xi32>
    %c0_5 = arith.constant 0 : index
    %c0_6 = arith.constant 0 : index
    %c0_7 = arith.constant 0 : index
    %12 = vector.load %arg4[%c0_5, %c0_6, %c0_7] : memref<1x2x8xf32, #tpu.memory_space<vmem>>, vector<1x2x8xf32>
    %13 = vector.shape_cast %12 : vector<1x2x8xf32> to vector<2x8xf32>
    %14 = vector.extract_strided_slice %13 {offsets = [0, 0], sizes = [1, 8], strides = [1, 1]} : vector<2x8xf32> to vector<1x8xf32>
    %15 = vector.extract_strided_slice %13 {offsets = [1, 0], sizes = [1, 8], strides = [1, 1]} : vector<2x8xf32> to vector<1x8xf32>
    %16 = vector.shape_cast %14 : vector<1x8xf32> to vector<1x8xf32>
    %17 = vector.broadcast %16 : vector<1x8xf32> to vector<7x8xf32>
    %18 = vector.shape_cast %15 : vector<1x8xf32> to vector<1x8xf32>
    %19 = vector.broadcast %18 : vector<1x8xf32> to vector<7x8xf32>
    %20 = arith.select %11, %17, %19 : vector<7x8xi1>, vector<7x8xf32>
    %21 = arith.addf %3, %20 : vector<7x8xf32>
    %c0_8 = arith.constant 0 : index
    %c0_9 = arith.constant 0 : index
    %c0_10 = arith.constant 0 : index
    %22 = vector.load %arg2[%c0_8, %c0_9, %c0_10] : memref<1x7x8xf32, #tpu.memory_space<vmem>>, vector<1x7x8xf32>
    %23 = vector.shape_cast %22 : vector<1x7x8xf32> to vector<7x8xf32>
    %cst_11 = arith.constant 0.000000e+00 : f32
    %24 = vector.broadcast %cst_11 : f32 to vector<7x8xf32>
    %25 = arith.cmpf ogt, %23, %24 : vector<7x8xf32>
    %cst_12 = arith.constant 0.000000e+00 : f32
    %26 = vector.broadcast %cst_12 : f32 to vector<7x8xf32>
    %27 = arith.select %25, %21, %26 : vector<7x8xi1>, vector<7x8xf32>
    %cst_13 = arith.constant 0.000000e+00 : f32
    %28 = vector.broadcast %cst_13 : f32 to vector<7x8xf32>
    %29 = arith.cmpf oge, %27, %28 : vector<7x8xf32>
    %cst_14 = arith.constant 0.00999999977 : f32
    %30 = vector.broadcast %cst_14 : f32 to vector<7x8xf32>
    %31 = arith.mulf %30, %27 : vector<7x8xf32>
    %32 = arith.select %29, %27, %31 : vector<7x8xi1>, vector<7x8xf32>
    %cst_15 = arith.constant dense<0xFF800000> : vector<7xf32>
    %33 = vector.multi_reduction <maximumf>, %32, %cst_15 [1] : vector<7x8xf32> to vector<7xf32>
    %34 = vector.shape_cast %33 : vector<7xf32> to vector<7x1xf32>
    %35 = vector.broadcast %34 : vector<7x1xf32> to vector<7x8xf32>
    %36 = arith.subf %32, %35 : vector<7x8xf32>
    %37 = math.exp %36 : vector<7x8xf32>
    %cst_16 = arith.constant dense<0.000000e+00> : vector<7xf32>
    %38 = vector.multi_reduction <add>, %37, %cst_16 [1] : vector<7x8xf32> to vector<7xf32>
    %39 = vector.shape_cast %38 : vector<7xf32> to vector<7x1xf32>
    %40 = tpu.reciprocal %39 {approx = true} : vector<7x1xf32> -> vector<7x1xf32>
    %41 = arith.mulf %39, %40 : vector<7x1xf32>
    %cst_17 = arith.constant 2.000000e+00 : f32
    %42 = vector.broadcast %cst_17 : f32 to vector<7x1xf32>
    %43 = arith.subf %42, %41 : vector<7x1xf32>
    %44 = arith.mulf %40, %43 : vector<7x1xf32>
    %45 = vector.broadcast %44 : vector<7x1xf32> to vector<7x8xf32>
    %46 = arith.mulf %37, %45 : vector<7x8xf32>
    %c0_18 = arith.constant 0 : index
    %c0_19 = arith.constant 0 : index
    %c0_20 = arith.constant 0 : index
    %47 = vector.load %arg5[%c0_18, %c0_19, %c0_20] : memref<1x7x8xf32, #tpu.memory_space<vmem>>, vector<1x7x8xf32>
    %48 = vector.shape_cast %47 : vector<1x7x8xf32> to vector<7x8xf32>
    %49 = vector.shape_cast %46 : vector<7x8xf32> to vector<1x7x8xf32>
    tpu.vector_store %arg5[%c0_18, %c0_19, %c0_20], %49 {strides = array<i32>} : memref<1x7x8xf32, #tpu.memory_space<vmem>>, vector<1x7x8xf32>,
    return
  }
  func.func @transform_0(%arg0: i32) -> (i32, i32, i32) {
    %c0_i32 = arith.constant 0 : i32
    %c0_i32_0 = arith.constant 0 : i32
    %c0_i32_1 = arith.constant 0 : i32
    return %arg0, %c0_i32, %c0_i32_0 : i32, i32, i32
  }
  func.func @transform_1(%arg0: i32) -> (i32, i32, i32) {
    %c0_i32 = arith.constant 0 : i32
    %c0_i32_0 = arith.constant 0 : i32
    %c0_i32_1 = arith.constant 0 : i32
    return %arg0, %c0_i32, %c0_i32_0 : i32, i32, i32
  }
  func.func @transform_2(%arg0: i32) -> (i32, i32) {
    %c0_i32 = arith.constant 0 : i32
    %c0_i32_0 = arith.constant 0 : i32
    %c0_i32_1 = arith.constant 0 : i32
    return %c0_i32, %c0_i32_0 : i32, i32
  }
  func.func @transform_3(%arg0: i32) -> (i32, i32, i32) {
    %c0_i32 = arith.constant 0 : i32
    %c0_i32_0 = arith.constant 0 : i32
    %c0_i32_1 = arith.constant 0 : i32
    return %arg0, %c0_i32, %c0_i32_0 : i32, i32, i32
  }
  func.func @transform_4(%arg0: i32) -> (i32, i32, i32) {
    %c0_i32 = arith.constant 0 : i32
    %c0_i32_0 = arith.constant 0 : i32
    %c0_i32_1 = arith.constant 0 : i32
    return %arg0, %c0_i32, %c0_i32_0 : i32, i32, i32
  }
}

</mosaic_0001>

<bundles_post_ra>
// kernel: _graph_attn_forward_impl.1
= control target key start
LH: loop header
LB: loop body
LE: loop exit
PB: predicated region body
PF: predicated region fallthrough
CT: control target
= control target key end

     0   :  { %s422_s15 = smov 0   ;;  %s456_s0 = inlined_call_operand.vmem [shape: f32[2,7,8], index: 0, kind: input, shape index: {}]   ;;  %s457_s1 = inlined_call_operand.vmem [shape: f32[2,7,8], index: 1, kind: input, shape index: {}]   ;;  %s458_s2 = inlined_call_operand.vmem [shape: f32[8,8], index: 2, kind: input, shape index: {}]   ;;  %s459_s3 = inlined_call_operand.vmem [shape: f32[2,2,8], index: 3, kind: input, shape index: {}]   ;;  %s460_s4 = inlined_call_operand.vmem [shape: f32[2,7,8], index: 4, kind: output, shape index: {}]  }
   0x1 LB: > { %s363_s16 = sadd.s32 4294967295, %s394_s15   ;;  %p367_p0 = scmp.ge.s32.totalorder %s394_s15, 1  ;;  %s394_s15 = sphi %s422_s15, %s14_s15  }
   0x2   : > { %p179_p1 = scmp.lt.s32.totalorder %s394_s15, 3 }
   0x4   : > { %p180_p2 = pnand %p367_p0, %p179_p1 }
   0x5   : > { %p211_p3 = scmp.lt.s32.totalorder (!%p180_p2), %s363_s16, 1 }
   0x6   : > { %183 = sbr.rel (%p180_p2) target bundleno = 408 (0x198), region = 36 }
   0xb   : > { %v228_v0 = vld [vmem:[%s458_s2] sm:$0xff]  ;;  %s462_s16 = smov (!%p211_p3, %s363_s16), 1  ;;  %vm240_vm0 = vcmask 64512   ;;  %v229_v2 = vlaneseq  ;;  %v396_v6 = vmov 3   ;;  %vm270_vm5 = vcmask 63488  }
   0xc   : > { %259 = vmatpush.msra.mxu0 %v228_v0  ;;  %s433_s19 = sshll.u32 %s462_s16, 3  ;;  %s370_s23 = sshll.u32 %s462_s16, 1 }
   0xd   : > { %s214_s22 = scalar_lea.vmem %s456_s0, %s433_s19  ;;  %v232_v3 = vand.u32 127, %v229_v2  ;;  %s222_s26 = scalar_lea.vmem %s459_s3, %s370_s23  ;;  %v230_v4 = vshrl.u32 %v229_v2, 7 }
   0xe   : > { %v227_v1 = vld [vmem:[%s214_s22] sm:$0x7f]  ;;  %s218_s29 = scalar_lea.vmem %s457_s1, %s433_s19  ;;  %s226_s6 = scalar_lea.vmem %s460_s4, %s433_s19 }
   0xf   : > { %372 = vmatmul.msk.f32.vlgmr.msra.gmra.mxu0 %vm240_vm0, %v227_v1  ;;  %vm233_vm1 = vcmp.lt.s32.totalorder %v232_v3, 4  ;;  %v236_v5 = vld [vmem:[%s222_s26] sm:$0x3] }
  0x10   : > { %v234_v7 = vsel %vm233_vm1, 4, %v396_v6  ;;  %v237_v8 = vperm.slane %v236_v5, 0  ;;  %v238_v9 = vperm.slane %v236_v5, 1  ;;  %v264_v10 = vld [vmem:[%s218_s29] sm:$0x7f] }
  0x11   : > { %vm235_vm2 = vcmp.lt.s32.totalorder %v230_v4, %v234_v7  ;;  %vm265_vm3 = vcmp.gt.f32.partialorder %v264_v10, 0.0 }
  0x12   : > { %v239_v11 = vsel %vm235_vm2, %v237_v8, %v238_v9 }
  0x8c   : > { %v261_v12 = vpop.f32.mrf.mxu0 }
  0x8d   : > { %v262_v13 = vadd.f32 %v261_v12, %v239_v11 }
  0x8f   : > { %v266_v14 = vsel %vm265_vm3, %v262_v13, 0.0 }
  0x90   : > { %v268_v15 = vmul.f32 0.01, %v266_v14  ;;  %vm267_vm4 = vcmp.ge.f32.partialorder %v266_v14, 0.0 }
  0x92   : > { %v269_v16 = vsel %vm267_vm4, %v266_v14, %v268_v15 }
  0x93   : > { %v271_v17 = vsel %vm270_vm5, %v269_v16, -inf }
  0x94   : > { %272 = vmax.xlane.f32.xlu0 %v271_v17 }
 0x107   : > { %v273_v18 = vpop.xlane.xlu0 %272 }
 0x108   : > { %v274_v19 = vsub.f32 %v269_v16, %v273_v18 }
 0x10a   : > { %v275_v20 = vmul.f32 1.442695, %v274_v19 }
 0x10c   : > { %384 = vpow2.f32 %v275_v20 }
 0x112   : > { %v385_v21 = vpop.eup %384 }
 0x113   : > { %v277_v22 = vsel %vm270_vm5, %v385_v21, 0.0 }
 0x114   : > { %278 = vadd.xlane.f32.xlu0 %v277_v22 }
 0x187   : > { %v279_v23 = vpop.xlane.xlu0 %278 }
 0x188   : > { %386 = vrcp.f32 %v279_v23 }
 0x18e   : > { %v387_v24 = vpop.eup %386 }
 0x18f   : > { %v281_v25 = vmul.f32 %v387_v24, %v279_v23 }
 0x191   : > { %v282_v26 = vsub.f32 2.0, %v281_v25 }
 0x193   : > { %v283_v27 = vmul.f32 %v387_v24, %v282_v26 }
 0x195   : > { %v284_v28 = vmul.f32 %v385_v21, %v283_v27 }
 0x197   : > { %285 = vst.msk [vmem:[%s226_s6] sm:$0x7f] %vm270_vm5, %v284_v28 }
 0x198 PF: > { %s14_s15 = sadd.s32 1, %s394_s15  }
 0x199   : > { %p11_p4 = scmp.ge.s32.totalorder %s14_s15, 4  }
 0x19b   :  { %13 = sbr.rel (!%p11_p4) target bundleno = 1 (0x1), region = 72 }

</bundles_post_ra>
